<compile_context>
chip_gen: v5e
topology: v5e:2x2
jax: 0.10.0
libtpu: 0.0.40
codegen_flags: <defaults>
</compile_context>

<pallas_src>
import math

import jax
import jax.numpy as jnp
from jax.experimental import pallas as pl
from jax.experimental.pallas import tpu as pltpu

SEQ_LEN_MAX = 96   # Config.seq_len  — PE buffer length; forward uses x.shape[1]
D_MODEL = 128      # Config.d_model  — multiple of the 128-lane vreg width
_LANE = 128        # vreg lane width; the last VMEM dim pads to this


def _build_pe(d_model: int, seq_len: int = SEQ_LEN_MAX) -> jnp.ndarray:
    """Sinusoidal positional-encoding table, identical to the PyTorch __init__
    (shape (seq_len, d_model), float32)."""
    position = jnp.arange(0, seq_len, dtype=jnp.float32)[:, None]            # (S, 1)
    div_term = jnp.exp(jnp.arange(0, d_model, 2, dtype=jnp.float32)
                       * (-math.log(10000.0) / d_model))                     # (D/2,)
    angles = position * div_term                                             # (S, D/2)
    pe = jnp.zeros((seq_len, d_model), dtype=jnp.float32)
    pe = pe.at[:, 0::2].set(jnp.sin(angles))
    pe = pe.at[:, 1::2].set(jnp.cos(angles))
    return pe


def _pad_lane(n: int) -> int:
    return ((n + _LANE - 1) // _LANE) * _LANE


def _pick_batch_tile(batch: int, vmem_bytes_per_row: int, stream_bytes_per_row: int, *,
                     vmem_budget: int = 10 << 20,
                     stream_target: int = 4 << 20,
                     min_grid_steps: int = 4) -> int:
    """Largest batch tile that
      (a) keeps the *real* double-buffered VMEM working set under ~10 MiB
          (safe under v5e's 16 MiB scoped default and v6e/v7x's 32 MiB,
          no vmem_limit override needed),
      (b) streams <= ~4 MiB of HBM per array per grid step (the ~85% HBM
          roofline plateau; also small enough for v7x's 64 MiB physical VMEM),
      (c) leaves >= min_grid_steps grid steps so the batch axis can shard
          across v7x's two TensorCores and stay double-buffered,
    and is a multiple of 8 (sublane alignment) or the full batch.
    """
    bt = min(batch,
             max(1, vmem_budget // max(vmem_bytes_per_row, 1)),
             max(1, stream_target // max(stream_bytes_per_row, 1)),
             max(1, -(-batch // min_grid_steps)))
    if bt >= batch:
        return batch
    if batch < 8:
        return batch                      # tiny batch: one full block
    bt = max(8, (bt // 8) * 8)
    return min(bt, batch)


# --------------------------------------------------------------------------
# Fused NeuroSTF front end:  input_proj (Linear)  +  PositionalEncoding add.
# Fusing the PE add into the projection kernel removes the extra full HBM
# read+write of the (B, S, d_model) activation a standalone PE kernel costs.
# --------------------------------------------------------------------------
def _proj_pe_kernel(x_ref, w_ref, bpe_ref, o_ref):
    # x_ref:   (bt, S, K)  activation tile (bf16)
    # w_ref:   (K, D)      projection weight (bf16; constant block -> VMEM resident)
    # bpe_ref: (1, S, D)   f32 bias + positional encoding (constant block)
    # o_ref:   (bt, S, D)  lane-dense output tile (D = 128)
    bt, s, k = x_ref.shape
    d = w_ref.shape[-1]
    # ONE MXU call per grid step: (bt*S, K) @ (K, D) with the RHS held resident.
    # The reshapes only merge/split the two leading (non-lane) dims and are
    # layout no-ops for S % 8 == 0 (Config.seq_len = 96).
    y = jnp.dot(x_ref[...].reshape(bt * s, k), w_ref[...],
                preferred_element_type=jnp.float32).reshape(bt, s, d)
    # f32 bias + PE add, broadcast over the batch dim, then one full-width store.
    o_ref[...] = (y + bpe_ref[...]).astype(o_ref.dtype)


def input_proj_pos_enc_forward(x_feat: jnp.ndarray, w: jnp.ndarray, b: jnp.ndarray,
                               pe_full: jnp.ndarray, *,
                               out_dtype=None,
                               compute_dtype=jnp.bfloat16) -> jnp.ndarray:
    """Equivalent to:  x = x_feat @ w + b ;  x = x + pe_full[None, :S, :]
    (dropout is identity in eval).  Set out_dtype=jnp.bfloat16 if downstream
    stages consume bf16 activations — the kernel is HBM-write-bound, so that
    halves its wall-clock."""
    B, S, K = x_feat.shape
    D = w.shape[-1]
    out_dtype = jnp.dtype(out_dtype) if out_dtype is not None else x_feat.dtype

    # Wrapper-level layout plumbing:
    #  * bias + PE folded into one f32 (1, S, D) constant (one same-shape-ish
    #    broadcast add per grid step, not per row),
    #  * activations / weight cast to bf16 for the MXU (fewer passes, half the
    #    x-tile HBM read); accumulation and the bias/PE add stay in f32.
    x_c = x_feat.astype(compute_dtype)
    w_c = w.astype(compute_dtype)
    bpe = (pe_full[:S, :].astype(jnp.float32) + b.astype(jnp.float32)[None, :])[None]

    in_isz = jnp.dtype(compute_dtype).itemsize
    out_isz = jnp.dtype(out_dtype).itemsize
    # Honest VMEM accounting: K lane-pads to 128, in/out tiles are each
    # double-buffered, and the f32 matmul result is a live VMEM intermediate.
    vmem_per_row = (2 * S * _pad_lane(K) * in_isz
                    + 2 * S * _pad_lane(D) * out_isz
                    + S * _pad_lane(D) * 4)
    stream_per_row = S * D * max(in_isz, out_isz)   # the output write dominates
    bt = _pick_batch_tile(B, vmem_per_row, stream_per_row)
    grid = (pl.cdiv(B, bt),)

    return pl.pallas_call(
        _proj_pe_kernel,
        out_shape=jax.ShapeDtypeStruct((B, S, D), out_dtype),
        grid=grid,
        in_specs=[
            pl.BlockSpec((bt, S, K), lambda i: (i, 0, 0)),
            pl.BlockSpec((K, D), lambda i: (0, 0)),         # fetched once
            pl.BlockSpec((1, S, D), lambda i: (0, 0, 0)),   # fetched once
        ],
        out_specs=pl.BlockSpec((bt, S, D), lambda i: (i, 0, 0)),
        compiler_params=pltpu.CompilerParams(
            dimension_semantics=("parallel",),   # batch tiles are independent
        ),
    )(x_c, w_c, bpe)


# --------------------------------------------------------------------------
# Standalone PositionalEncoding.forward (unfused path).  Prefer the fused
# front end in the real model — a standalone elementwise add is one extra
# full HBM read + write of the activation.  The input HBM buffer is reused
# for the output (input_output_aliases) so no extra HBM allocation is made.
# --------------------------------------------------------------------------
def _pe_add_kernel(x_ref, pe_ref, o_ref):
    # x_ref / o_ref: (bt, S*D) lane-dense rows;  pe_ref: (1, S*D), VMEM-resident.
    o_ref[...] = x_ref[...] + pe_ref[...]


def positional_encoding_forward(x: jnp.ndarray, pe_full: jnp.ndarray) -> jnp.ndarray:
    """PositionalEncoding.forward:  x + pe[:, :x.shape[1]]."""
    B, S, D = x.shape
    pe_row = pe_full[:S, :].astype(x.dtype).reshape(1, S * D)
    x2 = x.reshape(B, S * D)    # lane-dense rows (S*D is a multiple of 128 for D=128)

    isz = jnp.dtype(x.dtype).itemsize
    vmem_per_row = 2 * 2 * S * D * isz          # double-buffered in + out tiles
    stream_per_row = S * D * isz                # per streamed array
    bt = _pick_batch_tile(B, vmem_per_row, stream_per_row)
    grid = (pl.cdiv(B, bt),)

    out2 = pl.pallas_call(
        _pe_add_kernel,
        out_shape=jax.ShapeDtypeStruct((B, S * D), x.dtype),
        grid=grid,
        in_specs=[
            pl.BlockSpec((bt, S * D), lambda i: (i, 0)),
            pl.BlockSpec((1, S * D), lambda i: (0, 0)),     # fetched once
        ],
        out_specs=pl.BlockSpec((bt, S * D), lambda i: (i, 0)),
        input_output_aliases={0: 0},            # reuse x's HBM buffer for the output
        compiler_params=pltpu.CompilerParams(
            dimension_semantics=("parallel",),
        ),
    )(x2, pe_row)
    return out2.reshape(B, S, D)


if __name__ == "__main__":
    # Small shapes consistent with NeuroSTF: batch=2, seq=8, input_dim=8,
    # d_model=128 (Config.d_model — also the lane-dense width).
    B, S, IN_DIM, D = 2, 8, 8, D_MODEL

    key = jax.random.PRNGKey(0)
    kx, kw, kb = jax.random.split(key, 3)

    # Round x / w to bf16-representable f32 so the bf16 MXU matmul matches the
    # f32 HIGHEST-precision reference to tight tolerance.
    x_feat = jax.random.normal(kx, (B, S, IN_DIM), dtype=jnp.float32)
    x_feat = x_feat.astype(jnp.bfloat16).astype(jnp.float32)
    w = jax.random.normal(kw, (IN_DIM, D), dtype=jnp.float32) / math.sqrt(IN_DIM)
    w = w.astype(jnp.bfloat16).astype(jnp.float32)
    b = 0.1 * jax.random.normal(kb, (D,), dtype=jnp.float32)

    pe_full = _build_pe(D, SEQ_LEN_MAX)

    # --- fused input_proj + positional encoding (NeuroSTF front end) ---------
    out_fused = jax.block_until_ready(
        input_proj_pos_enc_forward(x_feat, w, b, pe_full))
    ref_fused = (jnp.dot(x_feat, w, precision=jax.lax.Precision.HIGHEST)
                 + b[None, None, :] + pe_full[None, :S, :])
    assert out_fused.shape == (B, S, D)
    assert out_fused.dtype == x_feat.dtype
    assert jnp.allclose(out_fused, ref_fused, atol=1e-4, rtol=1e-4), \
        "fused input_proj + PE mismatch vs reference"

    # Optional bf16-output path (for bf16 downstream activations — halves the
    # dominant HBM write).
    out_bf16 = jax.block_until_ready(
        input_proj_pos_enc_forward(x_feat, w, b, pe_full, out_dtype=jnp.bfloat16))
    assert out_bf16.dtype == jnp.bfloat16
    assert jnp.allclose(out_bf16.astype(jnp.float32), ref_fused,
                        atol=5e-2, rtol=5e-2), "bf16-output fused path mismatch"

    # --- standalone PositionalEncoding.forward --------------------------------
    x_act = ref_fused  # any (B, S, d_model) activation
    ref_pe = x_act + pe_full[None, :S, :]
    out_pe = jax.block_until_ready(positional_encoding_forward(x_act, pe_full))
    assert out_pe.shape == (B, S, D)
    assert jnp.allclose(out_pe, ref_pe, atol=1e-6), "PE add mismatch vs reference"

    # TODO(synk): the remaining NeuroSTF stages (NeuroplasticSparseAttention,
    # conv/GLU/BatchNorm mixer, MLP blocks, predictor head) are separate
    # kernels and are not implemented here.

    print("KERNEL_OK")
</pallas_src>

<mosaic_0001>
module attributes {stable_mosaic.version = 11 : i64} {
  func.func @_proj_pe_kernel(%arg0: i32, %arg1: memref<2x8x8xbf16, #tpu.memory_space<vmem>>, %arg2: memref<8x128xbf16, #tpu.memory_space<vmem>>, %arg3: memref<1x8x128xf32, #tpu.memory_space<vmem>>, %arg4: memref<2x8x128xf32, #tpu.memory_space<vmem>>) attributes {dimension_semantics = [#tpu.dimension_semantics<parallel>], iteration_bounds = array<i64: 1>, scalar_prefetch = 0 : i64, scratch_operands = 0 : i64, tpu.core_type = #tpu.core_type<tc>, window_params = [{transform_indices = @transform_0, window_bounds = array<i64: 2, 8, 8>}, {pipeline_mode = #tpu.pipeline_mode<synchronous>, transform_indices = @transform_1, window_bounds = array<i64: 8, 128>}, {pipeline_mode = #tpu.pipeline_mode<synchronous>, transform_indices = @transform_2, window_bounds = array<i64: 1, 8, 128>}, {transform_indices = @transform_3, window_bounds = array<i64: 2, 8, 128>}]} {
    %c0 = arith.constant 0 : index
    %c0_0 = arith.constant 0 : index
    %c0_1 = arith.constant 0 : index
    %0 = vector.load %arg1[%c0, %c0_0, %c0_1] : memref<2x8x8xbf16, #tpu.memory_space<vmem>>, vector<2x8x8xbf16>
    %1 = vector.shape_cast %0 : vector<2x8x8xbf16> to vector<16x8xbf16>
    %c0_2 = arith.constant 0 : index
    %c0_3 = arith.constant 0 : index
    %2 = vector.load %arg2[%c0_2, %c0_3] : memref<8x128xbf16, #tpu.memory_space<vmem>>, vector<8x128xbf16>
    %cst = arith.constant dense<0.000000e+00> : vector<16x128xf32>
    %3 = tpu.matmul %1, %2, %cst {dimension_numbers = #tpu.dot_dimension_numbers<[1], [0], [0], [1], [0, 0, 1, 1], [], []>} : vector<16x8xbf16>, vector<8x128xbf16>, vector<16x128xf32> -> vector<16x128xf32>
    %4 = vector.shape_cast %3 : vector<16x128xf32> to vector<2x8x128xf32>
    %c0_4 = arith.constant 0 : index
    %c0_5 = arith.constant 0 : index
    %c0_6 = arith.constant 0 : index
    %5 = vector.load %arg3[%c0_4, %c0_5, %c0_6] : memref<1x8x128xf32, #tpu.memory_space<vmem>>, vector<1x8x128xf32>
    %6 = vector.broadcast %5 : vector<1x8x128xf32> to vector<2x8x128xf32>
    %7 = arith.addf %4, %6 : vector<2x8x128xf32>
    %c0_7 = arith.constant 0 : index
    %c0_8 = arith.constant 0 : index
    %c0_9 = arith.constant 0 : index
    %8 = vector.load %arg4[%c0_7, %c0_8, %c0_9] : memref<2x8x128xf32, #tpu.memory_space<vmem>>, vector<2x8x128xf32>
    tpu.vector_store %arg4[%c0_7, %c0_8, %c0_9], %7 {strides = array<i32>} : memref<2x8x128xf32, #tpu.memory_space<vmem>>, vector<2x8x128xf32>,
    return
  }
  func.func @transform_0(%arg0: i32) -> (i32, i32, i32) {
    %c0_i32 = arith.constant 0 : i32
    %c0_i32_0 = arith.constant 0 : i32
    %c0_i32_1 = arith.constant 0 : i32
    return %arg0, %c0_i32, %c0_i32_0 : i32, i32, i32
  }
  func.func @transform_1(%arg0: i32) -> (i32, i32) {
    %c0_i32 = arith.constant 0 : i32
    %c0_i32_0 = arith.constant 0 : i32
    %c0_i32_1 = arith.constant 0 : i32
    return %c0_i32, %c0_i32_0 : i32, i32
  }
  func.func @transform_2(%arg0: i32) -> (i32, i32, i32) {
    %c0_i32 = arith.constant 0 : i32
    %c0_i32_0 = arith.constant 0 : i32
    %c0_i32_1 = arith.constant 0 : i32
    %c0_i32_2 = arith.constant 0 : i32
    return %c0_i32, %c0_i32_0, %c0_i32_1 : i32, i32, i32
  }
  func.func @transform_3(%arg0: i32) -> (i32, i32, i32) {
    %c0_i32 = arith.constant 0 : i32
    %c0_i32_0 = arith.constant 0 : i32
    %c0_i32_1 = arith.constant 0 : i32
    return %arg0, %c0_i32, %c0_i32_0 : i32, i32, i32
  }
}

</mosaic_0001>

<bundles_post_ra>
// kernel: tpu_custom_call.1
= control target key start
LH: loop header
LB: loop body
LE: loop exit
PB: predicated region body
PF: predicated region fallthrough
CT: control target
= control target key end

     0   :  { %8 = vsyncpa [#allocation3], 0  ;;  %s270_s0 = inlined_call_operand.hbm [shape: bf16[2,8,8], index: 0, kind: input, shape index: {}]   ;;  %s271_s1 = inlined_call_operand.hbm [shape: bf16[8,128], index: 1, kind: input, shape index: {}]   ;;  %s272_s2 = inlined_call_operand.hbm [shape: f32[1,8,128], index: 2, kind: input, shape index: {}]   ;;  %s273_s3 = inlined_call_operand.hbm [shape: f32[2,8,128], index: 3, kind: output, shape index: {}]  }
   0x1   :  { %9 = vsyncpa [#allocation6], 0  ;;  %s29_s14 = sshll.u32 %s271_s1, 4  ;;  %s30_s14 = int_to_ptr.hbm [resolvable:$true] %s29_s14 }
   0x2   :  { %10 = vsyncpa [#allocation4], 0  ;;  %s230_s15 = smov [#allocation5]   ;;  %s15_s19 = sshll.u32 %s270_s0, 4  ;;  %s16_s19 = int_to_ptr.hbm [resolvable:$true] %s15_s19 }
   0x3   :  { %s31_s16 = sshll.u32 %s230_s15, 4  ;;  %s231_s20 = smov [#allocation2]   ;;  %s32_s16 = int_to_ptr.vmem [resolvable:$true] %s31_s16 }
   0x4   :  { %34 = dma.hbm_to_vmem [thread:$0]  %s30_s14, 64, %s32_s16, [#allocation6]  }
   0x5   :  { %s17_s21 = sshll.u32 %s231_s20, 4  ;;  %s232_s22 = smov 64   ;;  %s18_s21 = int_to_ptr.vmem [resolvable:$true] %s17_s21 }
   0x6   :  { %s233_s23 = smov 4   ;;  %s40_s1 = sshll.u32 %s272_s2, 4  ;;  %s41_s1 = int_to_ptr.hbm [resolvable:$true] %s40_s1 }
   0x7   :  { %23 = dma.hbm_to_vmem [thread:$0]  %s16_s19, 128, %s18_s21, [#allocation3], %s232_s22, %s232_s22, %s233_s23  }
   0x8   :  { %s234_s26 = smov [#allocation7]  }
   0x9   :  { %s42_s27 = sshll.u32 %s234_s26, 4  ;;  %s43_s27 = int_to_ptr.vmem [resolvable:$true] %s42_s27 }
   0xa   :  { %45 = dma.hbm_to_vmem [thread:$0]  %s41_s1, 128, %s43_s27, [#allocation6]  }
   0xb   :  { %224 = dma.done.wait [#allocation3], 128  }
   0xc   :  { %225 = vsyncadd [#allocation3], 4294967168 }
   0xd   :  { %226 = dma.done.wait [#allocation6], 192  }
   0xe   :  { %227 = vsyncadd [#allocation6], 4294967104  ;;  %vm71_vm0 = vcmask 1043456   ;;  %v61_v0 = vld [vmem:[#allocation5] sm:$0xf]  ;;  %v119_v2 = vld [vmem:[#allocation2] sm:$0xff] }
   0xf   :  { %v73_v1 = vsel %vm71_vm0, %v61_v0, 0  ;;  %vm67_vm1 = vcmask 64512   ;;  %v89_v3 = vld [vmem:[#allocation7] sm:$0xff]  ;;  %s235_s0 = smov [#allocation8]   ;;  %s100_s30 = sshll.u32 %s273_s3, 4  ;;  %s101_s30 = int_to_ptr.hbm [resolvable:$true] %s100_s30 }
  0x10   :  { %82 = vmatpush.bf16.msra.mxu0 %v73_v1  ;;  %s98_s2 = sshll.u32 %s235_s0, 4  ;;  %s236_s4 = smov 128   ;;  %s99_s2 = int_to_ptr.vmem [resolvable:$true] %s98_s2 }
  0x11   :  { %s237_s5 = smov 8  }
  0x13   :  { %118 = vmatmul.msk.bf16.vlgmr.msra.gmra.mxu0 %vm67_vm1, %v119_v2 }
  0x90   :  { %v84_v4 = vpop.f32.mrf.mxu0 }
  0x91   :  { %v90_v5 = vadd.f32 %v89_v3, %v84_v4 }
  0x93   :  { %92 = vst [vmem:[#allocation8] sm:$0xff] %v90_v5 }
  0x98   :  { %v86_v6 = vpop.f32.mrf.mxu0 }
  0x99   :  { %v91_v7 = vadd.f32 %v89_v3, %v86_v6 }
  0x9b   :  { %93 = vst [vmem:[#allocation8 + $0x8] sm:$0xff] %v91_v7 }
  0x9c   :  { %106 = dma.vmem_to_hbm [thread:$0]  %s99_s2, 256, %s101_s30, [#allocation4], %s236_s4, %s236_s4, %s237_s5  }
  0x9d   :  { %228 = dma.done.wait [#allocation4], 256  }
  0x9e   :  { %229 = vsyncadd [#allocation4], 4294967040 }
  0x9f   :  { %111 = vsyncpa [#allocation3], 1 }
  0xa0   :  { %112 = vsyncpa [#allocation6], 1 }
  0xa1   :  { %113 = vsyncpa [#allocation4], 1 }

</bundles_post_ra>
